<compile_context>
chip_gen: v5e
topology: v5e:2x2
jax: 0.10.0
libtpu: 0.0.40
codegen_flags: <defaults>
</compile_context>

<pallas_src>
import jax
import jax.numpy as jnp
from jax.experimental import pallas as pl
from jax.experimental.pallas import tpu as pltpu


# ---------------------------------------------------------------------------
# Tiling constants (fit comfortably in the scoped-VMEM defaults of v5e/v6e/v7x;
# f32 worst case ~3 MiB of double-buffered tiles).
# ---------------------------------------------------------------------------
_TM = 256      # dense: rows of x per tile (clamped to round_up(M, 8))
_TN = 256      # dense: output features per tile (multiple of 128)
_TK = 512      # dense: contraction (hidden) per tile (multiple of 128)
_CHUNK = 256   # decode: gathered rows per chunk (multiple of 128)


def _round_up(v, m):
    return ((v + m - 1) // m) * m


# ---------------------------------------------------------------------------
# Dense (prefill) kernel: tiled matmul with f32 accumulator over the K grid axis
# ---------------------------------------------------------------------------
def _dense_matmul_kernel(x_ref, wt_ref, o_ref, acc_ref):
    # grid = (M/tm, N/tn, K/tk); K is the innermost ("arbitrary") reduction axis
    @pl.when(pl.program_id(2) == 0)
    def _():
        acc_ref[...] = jnp.zeros_like(acc_ref)

    acc_ref[...] += jnp.dot(x_ref[...], wt_ref[...],
                            preferred_element_type=jnp.float32)

    @pl.when(pl.program_id(2) == pl.num_programs(2) - 1)
    def _():
        o_ref[...] = acc_ref[...].astype(o_ref.dtype)


def _dense_matmul(x2d, w_t, tn, tk):
    """x2d: [M, K] ; w_t: [Kp, Np] pre-transposed + padded weight. Returns [M, Np]."""
    M, K = x2d.shape
    Kp, Np = w_t.shape
    tm = min(_TM, _round_up(M, 8))
    Mp = _round_up(M, tm)
    if (Mp, Kp) != (M, K):
        # zero padding of the contraction axis is mathematically a no-op
        x2d = jnp.pad(x2d, ((0, Mp - M), (0, Kp - K)))

    out = pl.pallas_call(
        _dense_matmul_kernel,
        out_shape=jax.ShapeDtypeStruct((Mp, Np), x2d.dtype),
        grid_spec=pltpu.PrefetchScalarGridSpec(
            num_scalar_prefetch=0,
            grid=(Mp // tm, Np // tn, Kp // tk),
            in_specs=[
                pl.BlockSpec((tm, tk), lambda i, j, k: (i, k)),
                pl.BlockSpec((tk, tn), lambda i, j, k: (k, j)),
            ],
            out_specs=pl.BlockSpec((tm, tn), lambda i, j, k: (i, j)),
            scratch_shapes=[pltpu.VMEM((tm, tn), jnp.float32)],
        ),
        compiler_params=pltpu.CompilerParams(
            dimension_semantics=("parallel", "parallel", "arbitrary")),
    )(x2d, w_t)
    return out[:M]


# ---------------------------------------------------------------------------
# Decode kernel: HBM row-gather (double-buffered per-row DMAs) + small matmul
# ---------------------------------------------------------------------------
def _gather_matmul_kernel(idx_ref, x_ref, w_hbm, o_ref, buf_ref, sem_ref):
    # idx_ref:  SMEM int32[n_padded]   (scalar-prefetched, clamped gather indices)
    # x_ref:    VMEM [M, K]            (resident across the whole grid)
    # w_hbm:    ANY/HBM [N, K]         (never copied wholesale into VMEM)
    # o_ref:    VMEM [M, chunk]        (one output slab per grid step)
    # buf_ref:  VMEM scratch [2, chunk, K]  (double buffer for gathered rows)
    # sem_ref:  DMA semaphores [2]     (one per buffer slot)
    c = pl.program_id(0)
    n_chunks = pl.num_programs(0)
    chunk = buf_ref.shape[1]

    def issue(chunk_id, slot):
        # one async copy per gathered row (rows are scattered in HBM)
        def body(r, carry):
            row = idx_ref[chunk_id * chunk + r]
            pltpu.make_async_copy(
                w_hbm.at[pl.ds(row, 1), :],
                buf_ref.at[slot, pl.ds(r, 1), :],
                sem_ref.at[slot],
            ).start()
            return carry
        jax.lax.fori_loop(0, chunk, body, 0)

    slot = c % 2

    # prime the pipeline with chunk 0
    @pl.when(c == 0)
    def _():
        issue(0, 0)

    # prefetch chunk c+1 into the other slot while we compute chunk c
    @pl.when(c + 1 < n_chunks)
    def _():
        issue(c + 1, 1 - slot)

    # wait for all row copies of the current chunk (one matching wait per start)
    def wait_body(r, carry):
        pltpu.make_async_copy(
            w_hbm.at[pl.ds(0, 1), :],
            buf_ref.at[slot, pl.ds(r, 1), :],
            sem_ref.at[slot],
        ).wait()
        return carry
    jax.lax.fori_loop(0, chunk, wait_body, 0)

    # o = x @ gathered_rows.T   (M is tiny; decode is HBM-bandwidth-bound)
    o_ref[...] = jax.lax.dot_general(
        x_ref[...], buf_ref[slot],
        dimension_numbers=(((1,), (1,)), ((), ())),
        preferred_element_type=jnp.float32,
    ).astype(o_ref.dtype)


def _gated_matmul(x2d, weight, idx_padded, chunk):
    """x2d: [M, K]; weight: [N, K] (stays in HBM); idx_padded: int32[n_padded]."""
    M, K = x2d.shape
    n_padded = idx_padded.shape[0]
    n_chunks = n_padded // chunk

    return pl.pallas_call(
        _gather_matmul_kernel,
        out_shape=jax.ShapeDtypeStruct((M, n_padded), x2d.dtype),
        grid_spec=pltpu.PrefetchScalarGridSpec(
            num_scalar_prefetch=1,                 # indices -> SMEM
            grid=(n_chunks,),
            in_specs=[
                pl.BlockSpec((M, K), lambda c, idx: (0, 0)),
                pl.BlockSpec(memory_space=pl.ANY),  # weight stays in HBM
            ],
            out_specs=pl.BlockSpec((M, chunk), lambda c, idx: (0, c)),
            scratch_shapes=[
                pltpu.VMEM((2, chunk, K), weight.dtype),
                pltpu.SemaphoreType.DMA((2,)),
            ],
        ),
        compiler_params=pltpu.CompilerParams(
            # cross-iteration double-buffering via scratch => must be sequential
            dimension_semantics=("arbitrary",)),
    )(idx_padded, x2d, weight)


# ---------------------------------------------------------------------------
# GateLayer wrapper
# ---------------------------------------------------------------------------
class GateLayer:
    """JAX/Pallas port of the PyTorch GateLayer."""

    def __init__(self, weight, num, sparsity, memory_limit, indices_list_all):
        N, K = weight.shape
        self.weight = weight                       # [N, K], used by the decode HBM gather
        self.neuron_num = int(N * sparsity)
        self.num = num
        self.memory_limit = memory_limit
        # TODO(synk): the PyTorch `weight_updated` caching and `.cpu()` host offload
        # are stateful host-side bookkeeping with no device-kernel equivalent; the
        # HBM row-gather is recomputed inside the kernel on every decode call.

        # ---- dense branch: pre-transposed (K-major), tile-padded weight copy ----
        # (In production store this as bf16 to halve HBM traffic / double MXU rate.)
        self.tn = min(_TN, _round_up(N, 128))
        self.tk = min(_TK, _round_up(K, 128))
        Kp = _round_up(K, self.tk)
        Np = _round_up(N, self.tn)
        w_t = jnp.swapaxes(weight, 0, 1)           # [K, N]
        self.weight_kn = jnp.pad(w_t, ((0, Kp - K), (0, Np - N)))
        self.n_out = N

        # ---- decode branch: clamped, 128-multiple-padded gather indices ----
        idx = jnp.asarray(indices_list_all[num - 6][: self.neuron_num], jnp.int32)
        idx = jnp.clip(idx, 0, N - 1)              # host-side bounds check (DMA gather has none)
        self.chunk = min(_CHUNK, _round_up(max(self.neuron_num, 1), 128))
        n_padded = _round_up(max(self.neuron_num, 1), self.chunk)
        self.idx_padded = jnp.pad(idx, (0, n_padded - self.neuron_num))  # pad with row 0

    def __call__(self, x):
        B, S, H = x.shape
        if S > 1:
            # prefill: true_value = x @ weight.T
            out = _dense_matmul(x.reshape(B * S, H), self.weight_kn, self.tn, self.tk)
            return out[:, : self.n_out].reshape(B, S, self.n_out)
        else:
            # decode: filtered_W = weight[indices]; true_value = x @ filtered_W.T
            out = _gated_matmul(x.reshape(B, H), self.weight,
                                self.idx_padded, self.chunk)
            return out[:, : self.neuron_num].reshape(B, 1, self.neuron_num)


# ---------------------------------------------------------------------------
# Demo / self-check
# ---------------------------------------------------------------------------
if __name__ == "__main__":
    key = jax.random.PRNGKey(0)
    k_w, k_x1, k_x2, k_idx = jax.random.split(key, 4)

    batch, seq, hidden, out_features = 2, 8, 32, 64
    sparsity = 0.25
    neuron_num = int(out_features * sparsity)      # 16

    weight = jax.random.normal(k_w, (out_features, hidden), dtype=jnp.float32)

    # deterministic stand-in for the global `indices_list_all` (num == 6 -> slot 0)
    indices_list_all = [
        jax.random.permutation(k_idx, out_features)[:neuron_num].astype(jnp.int32)
    ]

    layer = GateLayer(weight, num=6, sparsity=sparsity,
                      memory_limit=False, indices_list_all=indices_list_all)

    # --- dense branch (seq > 1) ---
    x_dense = jax.random.normal(k_x1, (batch, seq, hidden), dtype=jnp.float32)
    y_dense = jax.block_until_ready(layer(x_dense))
    ref_dense = x_dense @ weight.T
    assert y_dense.shape == (batch, seq, out_features)
    assert jnp.allclose(y_dense, ref_dense, atol=2e-2, rtol=2e-2)

    # --- sparse / decode branch (seq == 1) ---
    x_sparse = jax.random.normal(k_x2, (batch, 1, hidden), dtype=jnp.float32)
    y_sparse = jax.block_until_ready(layer(x_sparse))
    filtered_W = weight[indices_list_all[0], :]
    ref_sparse = x_sparse @ filtered_W.T
    assert y_sparse.shape == (batch, 1, neuron_num)
    assert jnp.allclose(y_sparse, ref_sparse, atol=2e-2, rtol=2e-2)

    print("KERNEL_OK")
</pallas_src>

<mosaic_0001>
module attributes {stable_mosaic.version = 11 : i64} {
  func.func @_dense_matmul_kernel(%arg0: i32, %arg1: i32, %arg2: i32, %arg3: memref<16x128xf32, #tpu.memory_space<vmem>>, %arg4: memref<128x128xf32, #tpu.memory_space<vmem>>, %arg5: memref<16x128xf32, #tpu.memory_space<vmem>>, %arg6: memref<16x128xf32, #tpu.memory_space<vmem>>) attributes {dimension_semantics = [#tpu.dimension_semantics<parallel>, #tpu.dimension_semantics<parallel>, #tpu.dimension_semantics<arbitrary>], iteration_bounds = array<i64: 1, 1, 1>, scalar_prefetch = 0 : i64, scratch_operands = 1 : i64, tpu.core_type = #tpu.core_type<tc>, window_params = [{transform_indices = @transform_0, window_bounds = array<i64: 16, 128>}, {transform_indices = @transform_1, window_bounds = array<i64: 128, 128>}, {transform_indices = @transform_2, window_bounds = array<i64: 16, 128>}]} {
    %c0_i32 = arith.constant 0 : i32
    %0 = arith.cmpi eq, %arg2, %c0_i32 : i32
    %1 = arith.extui %0 : i1 to i32
    %c0_i32_0 = arith.constant 0 : i32
    %2 = arith.cmpi ne, %1, %c0_i32_0 : i32
    scf.if %2 {
      %cst_10 = arith.constant 0.000000e+00 : f32
      %12 = vector.broadcast %cst_10 : f32 to vector<16x128xf32>
      %c0_11 = arith.constant 0 : index
      %c0_12 = arith.constant 0 : index
      %13 = vector.load %arg6[%c0_11, %c0_12] : memref<16x128xf32, #tpu.memory_space<vmem>>, vector<16x128xf32>
      tpu.vector_store %arg6[%c0_11, %c0_12], %12 {strides = array<i32>} : memref<16x128xf32, #tpu.memory_space<vmem>>, vector<16x128xf32>,
    } else {
    }
    %c0 = arith.constant 0 : index
    %c0_1 = arith.constant 0 : index
    %3 = vector.load %arg6[%c0, %c0_1] : memref<16x128xf32, #tpu.memory_space<vmem>>, vector<16x128xf32>
    %c0_2 = arith.constant 0 : index
    %c0_3 = arith.constant 0 : index
    %4 = vector.load %arg3[%c0_2, %c0_3] : memref<16x128xf32, #tpu.memory_space<vmem>>, vector<16x128xf32>
    %c0_4 = arith.constant 0 : index
    %c0_5 = arith.constant 0 : index
    %5 = vector.load %arg4[%c0_4, %c0_5] : memref<128x128xf32, #tpu.memory_space<vmem>>, vector<128x128xf32>
    %cst = arith.constant dense<0.000000e+00> : vector<16x128xf32>
    %6 = tpu.matmul %4, %5, %cst {dimension_numbers = #tpu.dot_dimension_numbers<[1], [0], [0], [1], [0, 0, 1, 1], [], []>} : vector<16x128xf32>, vector<128x128xf32>, vector<16x128xf32> -> vector<16x128xf32>
    %7 = arith.addf %3, %6 : vector<16x128xf32>
    %c0_6 = arith.constant 0 : index
    %c0_7 = arith.constant 0 : index
    %8 = vector.load %arg6[%c0_6, %c0_7] : memref<16x128xf32, #tpu.memory_space<vmem>>, vector<16x128xf32>
    tpu.vector_store %arg6[%c0_6, %c0_7], %7 {strides = array<i32>} : memref<16x128xf32, #tpu.memory_space<vmem>>, vector<16x128xf32>,
    %c0_i32_8 = arith.constant 0 : i32
    %9 = arith.cmpi eq, %arg2, %c0_i32_8 : i32
    %10 = arith.extui %9 : i1 to i32
    %c0_i32_9 = arith.constant 0 : i32
    %11 = arith.cmpi ne, %10, %c0_i32_9 : i32
    scf.if %11 {
      %c0_10 = arith.constant 0 : index
      %c0_11 = arith.constant 0 : index
      %12 = vector.load %arg6[%c0_10, %c0_11] : memref<16x128xf32, #tpu.memory_space<vmem>>, vector<16x128xf32>
      %c0_12 = arith.constant 0 : index
      %c0_13 = arith.constant 0 : index
      %13 = vector.load %arg5[%c0_12, %c0_13] : memref<16x128xf32, #tpu.memory_space<vmem>>, vector<16x128xf32>
      tpu.vector_store %arg5[%c0_12, %c0_13], %12 {strides = array<i32>} : memref<16x128xf32, #tpu.memory_space<vmem>>, vector<16x128xf32>,
    } else {
    }
    return
  }
  func.func @transform_0(%arg0: i32, %arg1: i32, %arg2: i32) -> (i32, i32) {
    %c0_i32 = arith.constant 0 : i32
    return %arg0, %arg2 : i32, i32
  }
  func.func @transform_1(%arg0: i32, %arg1: i32, %arg2: i32) -> (i32, i32) {
    %c0_i32 = arith.constant 0 : i32
    return %arg2, %arg1 : i32, i32
  }
  func.func @transform_2(%arg0: i32, %arg1: i32, %arg2: i32) -> (i32, i32) {
    %c0_i32 = arith.constant 0 : i32
    return %arg0, %arg1 : i32, i32
  }
}

</mosaic_0001>

<bundles_post_ra>
// kernel: tpu_custom_call.1
= control target key start
LH: loop header
LB: loop body
LE: loop exit
PB: predicated region body
PF: predicated region fallthrough
CT: control target
= control target key end

     0   :  { %7 = vsyncpa [#allocation4], 0  ;;  %s261_s0 = inlined_call_operand.hbm [shape: f32[16,128], index: 0, kind: input, shape index: {}]   ;;  %s262_s1 = inlined_call_operand.hbm [shape: f32[128,128], index: 1, kind: input, shape index: {}]   ;;  %s263_s2 = inlined_call_operand.hbm [shape: f32[16,128], index: 2, kind: output, shape index: {}]  }
   0x1   :  { %8 = vsyncpa [#allocation7], 0 }
   0x2   :  { %9 = vsyncpa [#allocation5], 0  ;;  %s14_s11 = sshll.u32 %s261_s0, 4  ;;  %s223_s12 = smov [#allocation3]   ;;  %s15_s11 = int_to_ptr.hbm [resolvable:$true] %s14_s11 }
   0x3   :  { %s16_s13 = sshll.u32 %s223_s12, 4  ;;  %s27_s16 = sshll.u32 %s262_s1, 4  ;;  %s17_s13 = int_to_ptr.vmem [resolvable:$true] %s16_s13  ;;  %s28_s16 = int_to_ptr.hbm [resolvable:$true] %s27_s16 }
   0x4   :  { %s224_s17 = smov 128   ;;  %s225_s18 = smov 8  }
   0x5   :  { %22 = dma.hbm_to_vmem [thread:$0]  %s15_s11, 256, %s17_s13, [#allocation4], %s224_s17, %s224_s17, %s225_s18  }
   0x6   :  { %s226_s19 = smov [#allocation6]  }
   0x7   :  { %s29_s20 = sshll.u32 %s226_s19, 4  ;;  %s30_s20 = int_to_ptr.vmem [resolvable:$true] %s29_s20 }
   0x8   :  { %35 = dma.hbm_to_vmem [thread:$0]  %s28_s16, 2048, %s30_s20, [#allocation7], %s224_s17, %s224_s17, %s225_s18  }
   0x9   :  { %217 = dma.done.wait [#allocation4], 256  }
   0xa   :  { %218 = vsyncadd [#allocation4], 4294967040 }
   0xb   :  { %219 = dma.done.wait [#allocation7], 2048  }
   0xc   :  { %220 = vsyncadd [#allocation7], 4294965248  ;;  %v69_v0 = vld [vmem:[#allocation6 + $0x78] sm:$0xff]  ;;  %v68_v1 = vld [vmem:[#allocation6 + $0x70] sm:$0xff]  ;;  %s227_s0 = smov [#allocation8]   ;;  %s110_s23 = sshll.u32 %s263_s2, 4  ;;  %s111_s23 = int_to_ptr.hbm [resolvable:$true] %s110_s23 }
   0xd   :  { %70 = vmatpush.msra.mxu0 %v69_v0  ;;  %124 = vmatpush.msra.mxu1 %v69_v0  ;;  %v67_v2 = vld [vmem:[#allocation6 + $0x68] sm:$0xff]  ;;  %v66_v3 = vld [vmem:[#allocation6 + $0x60] sm:$0xff]  ;;  %v65_v4 = vld [vmem:[#allocation6 + $0x58] sm:$0xff]  ;;  %s108_s1 = sshll.u32 %s227_s0, 4  ;;  %s109_s1 = int_to_ptr.vmem [resolvable:$true] %s108_s1 }
   0xe   :  { %v64_v5 = vld [vmem:[#allocation6 + $0x50] sm:$0xff]  ;;  %v63_v6 = vld [vmem:[#allocation6 + $0x48] sm:$0xff]  ;;  %v62_v7 = vld [vmem:[#allocation6 + $0x40] sm:$0xff] }
   0xf   :  { %71 = vmatpush.msra.mxu0 %v68_v1  ;;  %125 = vmatpush.msra.mxu1 %v68_v1  ;;  %v61_v8 = vld [vmem:[#allocation6 + $0x38] sm:$0xff]  ;;  %v60_v9 = vld [vmem:[#allocation6 + $0x30] sm:$0xff]  ;;  %v59_v10 = vld [vmem:[#allocation6 + $0x28] sm:$0xff] }
  0x10   :  { %v58_v11 = vld [vmem:[#allocation6 + $0x20] sm:$0xff]  ;;  %v57_v12 = vld [vmem:[#allocation6 + $0x18] sm:$0xff]  ;;  %v56_v13 = vld [vmem:[#allocation6 + $0x10] sm:$0xff] }
  0x11   :  { %72 = vmatpush.msra.mxu0 %v67_v2  ;;  %126 = vmatpush.msra.mxu1 %v67_v2  ;;  %v55_v14 = vld [vmem:[#allocation6 + $0x8] sm:$0xff]  ;;  %v54_v15 = vld [vmem:[#allocation6] sm:$0xff]  ;;  %v52_v16 = vld [vmem:[#allocation3] sm:$0xff] }
  0x12   :  { %v53_v17 = vld [vmem:[#allocation3 + $0x8] sm:$0xff] }
  0x13   :  { %73 = vmatpush.msra.mxu0 %v66_v3  ;;  %127 = vmatpush.msra.mxu1 %v66_v3 }
  0x15   :  { %74 = vmatpush.msra.mxu0 %v65_v4  ;;  %128 = vmatpush.msra.mxu1 %v65_v4 }
  0x17   :  { %75 = vmatpush.msra.mxu0 %v64_v5  ;;  %129 = vmatpush.msra.mxu1 %v64_v5 }
  0x19   :  { %76 = vmatpush.msra.mxu0 %v63_v6  ;;  %130 = vmatpush.msra.mxu1 %v63_v6 }
  0x1b   :  { %77 = vmatpush.msra.mxu0 %v62_v7  ;;  %131 = vmatpush.msra.mxu1 %v62_v7 }
  0x1d   :  { %78 = vmatpush.msra.mxu0 %v61_v8  ;;  %132 = vmatpush.msra.mxu1 %v61_v8 }
  0x1f   :  { %79 = vmatpush.msra.mxu0 %v60_v9  ;;  %133 = vmatpush.msra.mxu1 %v60_v9 }
  0x21   :  { %80 = vmatpush.msra.mxu0 %v59_v10  ;;  %134 = vmatpush.msra.mxu1 %v59_v10 }
  0x23   :  { %81 = vmatpush.msra.mxu0 %v58_v11  ;;  %135 = vmatpush.msra.mxu1 %v58_v11 }
  0x25   :  { %82 = vmatpush.msra.mxu0 %v57_v12  ;;  %136 = vmatpush.msra.mxu1 %v57_v12 }
  0x27   :  { %83 = vmatpush.msra.mxu0 %v56_v13  ;;  %137 = vmatpush.msra.mxu1 %v56_v13 }
  0x29   :  { %84 = vmatpush.msra.mxu0 %v55_v14  ;;  %138 = vmatpush.msra.mxu1 %v55_v14 }
  0x2b   :  { %85 = vmatpush.msra.mxu0 %v54_v15  ;;  %139 = vmatpush.msra.mxu1 %v54_v15 }
  0x2c   :  { %86 = vmatmul.f32.vlgmr.msra.gmra.mxu0 %v52_v16  ;;  %89 = vmatmul.f32.vlgmr.msra.gmra.mxu1 %v53_v17 }
  0xa9   :  { %v87_v18 = vpop.f32.mrf.mxu0  ;;  %v90_v19 = vpop.f32.mrf.mxu1 }
  0xaa   :  { %102 = vst [vmem:[#allocation8] sm:$0xff] %v87_v18 }
  0xab   :  { %103 = vst [vmem:[#allocation8 + $0x8] sm:$0xff] %v90_v19 }
  0xac   :  { %116 = dma.vmem_to_hbm [thread:$0]  %s109_s1, 256, %s111_s23, [#allocation5], %s224_s17, %s224_s17, %s225_s18  }
  0xad   :  { %221 = dma.done.wait [#allocation5], 256  }
  0xae   :  { %222 = vsyncadd [#allocation5], 4294967040 }
  0xaf   :  { %121 = vsyncpa [#allocation4], 1 }
  0xb0   :  { %122 = vsyncpa [#allocation7], 1 }
  0xb1   :  { %123 = vsyncpa [#allocation5], 1 }

</bundles_post_ra>
